<compile_context>
chip_gen: v5e
topology: v5e:2x2
jax: 0.10.0
libtpu: 0.0.40
codegen_flags: <defaults>
</compile_context>

<pallas_src>
import jax
import jax.numpy as jnp
from jax.experimental import pallas as pl
from jax.experimental.pallas import tpu as pltpu


def psa_flash_kernel(xq_ref, xk_ref, wq_ref, wk_ref, wv_ref,
                     bq_ref, bk_ref, bv_ref, gamma_ref,
                     out_ref, m_sc, l_sc, acc_sc):
    ki = pl.program_id(2)

    @pl.when(ki == 0)
    def _init():
        m_sc[...] = jnp.full_like(m_sc, -jnp.inf)
        l_sc[...] = jnp.zeros_like(l_sc)
        acc_sc[...] = jnp.zeros_like(acc_sc)

    # bf16 MXU operands, f32 accumulation. Residual below uses the f32 x tile.
    xq_b = xq_ref[...].astype(jnp.bfloat16)                              # (C, TQ)
    xk_b = xk_ref[...].astype(jnp.bfloat16)                              # (C, TK)

    # 1x1-conv projections: canonical (out_ch, C) @ (C, tile) matmuls, lane-dense.
    q = jnp.dot(wq_ref[...], xq_b,
                preferred_element_type=jnp.float32) + bq_ref[...]       # (C8, TQ)
    k = jnp.dot(wk_ref[...], xk_b,
                preferred_element_type=jnp.float32) + bk_ref[...]       # (C8, TK)
    v = jnp.dot(wv_ref[...], xk_b,
                preferred_element_type=jnp.float32) + bv_ref[...]       # (C, TK)

    # Transposed energy tile: e_t[m, n] = sum_c q[c, n] * k[c, m].
    # Only the (C8, TK) sliver of k is transposed (a vreg or two); kept in f32 since
    # the contraction depth is only C8.
    e_t = jnp.dot(k.T, q, preferred_element_type=jnp.float32)           # (TK, TQ)

    # Online softmax over the key axis (axis 0 of e_t). Stats are (1, TQ) rows so the
    # corrections broadcast over the (C, TQ) accumulator with no relayout.
    m_prev = m_sc[...]
    m_new = jnp.maximum(m_prev, jnp.max(e_t, axis=0, keepdims=True))    # (1, TQ)
    alpha = jnp.exp(m_prev - m_new)                                     # (1, TQ)
    p_t = jnp.exp(e_t - m_new)                                          # (TK, TQ)
    l_sc[...] = alpha * l_sc[...] + jnp.sum(p_t, axis=0, keepdims=True)
    # Canonical (C, TK) @ (TK, TQ) MXU matmul with bf16 operands, f32 accumulate.
    acc_sc[...] = alpha * acc_sc[...] + jnp.dot(
        v.astype(jnp.bfloat16), p_t.astype(jnp.bfloat16),
        preferred_element_type=jnp.float32)                             # (C, TQ)
    m_sc[...] = m_new

    @pl.when(ki == pl.num_programs(2) - 1)
    def _finalize():
        # Normalize only the (C, TQ) output (EUP reciprocal), never the (TK, TQ) probs.
        inv_l = pl.reciprocal(l_sc[...], approx=True)                   # (1, TQ)
        o = acc_sc[...] * inv_l                                         # (C, TQ)
        out_ref[...] = (gamma_ref[0] * o + xq_ref[...]).astype(out_ref.dtype)


def _pick_tile(n, cap=512):
    """Largest multiple of 128 that divides n (capped); else the full extent."""
    best = 0
    t = 128
    while t <= min(cap, n):
        if n % t == 0:
            best = t
        t += 128
    return best if best else n


def psa_forward(x_nchw, wq, bq, wk, bk, wv, bv, gamma, *, tq=None, tk=None):
    """x_nchw: (B, C, W, H). 1x1-conv weights: wq/wk (C8, C), wv (C, C)."""
    B, C, W, H = x_nchw.shape
    C8 = wq.shape[0]
    N = W * H

    tq = _pick_tile(N) if tq is None else tq
    tk = _pick_tile(N) if tk is None else tk
    assert N % tq == 0 and N % tk == 0, "query/key tiles must divide W*H"

    # (B, C, W, H) -> (B, C, N): reshape only -- no HBM transposes on input or output.
    x_bcn = x_nchw.reshape(B, C, N)

    wq_b = wq.astype(jnp.bfloat16)
    wk_b = wk.astype(jnp.bfloat16)
    wv_b = wv.astype(jnp.bfloat16)
    bq_c = bq.reshape(C8, 1).astype(jnp.float32)
    bk_c = bk.reshape(C8, 1).astype(jnp.float32)
    bv_c = bv.reshape(C, 1).astype(jnp.float32)
    gamma_s = gamma.reshape(1).astype(jnp.float32)

    grid = (B, N // tq, N // tk)
    out_bcn = pl.pallas_call(
        psa_flash_kernel,
        out_shape=jax.ShapeDtypeStruct((B, C, N), x_nchw.dtype),
        grid_spec=pltpu.PrefetchScalarGridSpec(
            num_scalar_prefetch=0,
            grid=grid,
            in_specs=[
                pl.BlockSpec((None, C, tq), lambda b, qi, ki: (b, 0, qi)),  # x, query tile
                pl.BlockSpec((None, C, tk), lambda b, qi, ki: (b, 0, ki)),  # x, key/value tile
                pl.BlockSpec((C8, C), lambda b, qi, ki: (0, 0)),            # Wq (bf16)
                pl.BlockSpec((C8, C), lambda b, qi, ki: (0, 0)),            # Wk (bf16)
                pl.BlockSpec((C, C), lambda b, qi, ki: (0, 0)),             # Wv (bf16)
                pl.BlockSpec((C8, 1), lambda b, qi, ki: (0, 0)),            # bq
                pl.BlockSpec((C8, 1), lambda b, qi, ki: (0, 0)),            # bk
                pl.BlockSpec((C, 1), lambda b, qi, ki: (0, 0)),             # bv
                pl.BlockSpec(memory_space=pltpu.MemorySpace.SMEM),          # gamma scalar
            ],
            out_specs=pl.BlockSpec((None, C, tq), lambda b, qi, ki: (b, 0, qi)),
            scratch_shapes=[
                pltpu.VMEM((1, tq), jnp.float32),   # running max m
                pltpu.VMEM((1, tq), jnp.float32),   # running sum l
                pltpu.VMEM((C, tq), jnp.float32),   # output accumulator
            ],
        ),
        compiler_params=pltpu.CompilerParams(
            dimension_semantics=("parallel", "parallel", "arbitrary")),
    )(x_bcn, x_bcn, wq_b, wk_b, wv_b, bq_c, bk_c, bv_c, gamma_s)

    return out_bcn.reshape(B, C, W, H)


def psa_reference(x_nchw, wq, bq, wk, bk, wv, bv, gamma):
    """Pure-JAX f32 reference mirroring the PyTorch forward."""
    B, C, W, H = x_nchw.shape
    N = W * H
    x_flat = x_nchw.reshape(B, C, N)                                     # (B, C, N)
    q = jnp.einsum('oc,bcn->bon', wq, x_flat) + bq[None, :, None]        # (B, C8, N)
    k = jnp.einsum('oc,bcn->bon', wk, x_flat) + bk[None, :, None]        # (B, C8, N)
    v = jnp.einsum('oc,bcn->bon', wv, x_flat) + bv[None, :, None]        # (B, C, N)
    energy = jnp.einsum('bcn,bcm->bnm', q, k)                            # (B, N, N)
    attn = jax.nn.softmax(energy, axis=-1)
    out = jnp.einsum('bcm,bnm->bcn', v, attn)                            # (B, C, N)
    return gamma * out.reshape(B, C, W, H) + x_nchw


if __name__ == "__main__":
    B, C, W, H = 2, 16, 16, 16     # in_dim = 16 -> query/key channels = 16 // 8 = 2
    C8 = C // 8

    key = jax.random.PRNGKey(0)
    k_x, k_wq, k_bq, k_wk, k_bk, k_wv, k_bv = jax.random.split(key, 7)

    x = jax.random.normal(k_x, (B, C, W, H), dtype=jnp.float32)
    wq = jax.random.normal(k_wq, (C8, C), dtype=jnp.float32) * 0.1
    bq = jax.random.normal(k_bq, (C8,), dtype=jnp.float32) * 0.1
    wk = jax.random.normal(k_wk, (C8, C), dtype=jnp.float32) * 0.1
    bk = jax.random.normal(k_bk, (C8,), dtype=jnp.float32) * 0.1
    wv = jax.random.normal(k_wv, (C, C), dtype=jnp.float32) * 0.1
    bv = jax.random.normal(k_bv, (C,), dtype=jnp.float32) * 0.1
    # nn.Parameter(torch.zeros(1)); set nonzero so the attention path is exercised.
    gamma = jnp.array([0.5], dtype=jnp.float32)

    # tq = tk = 128 so the small demo exercises multiple query tiles AND the
    # multi-step online-softmax accumulation (grid = (2, 2, 2)).
    out = psa_forward(x, wq, bq, wk, bk, wv, bv, gamma, tq=128, tk=128)
    out = jax.block_until_ready(out)

    ref = psa_reference(x, wq, bq, wk, bk, wv, bv, gamma)
    assert out.shape == (B, C, W, H)
    # bf16 MXU operands + approx reciprocal -> slightly loosened tolerance vs f32 ref.
    assert jnp.allclose(out, ref, atol=2e-2, rtol=2e-2), "mismatch vs reference"

    print("KERNEL_OK")
</pallas_src>

<mosaic_0001>
module attributes {stable_mosaic.version = 11 : i64} {
  func.func @psa_flash_kernel(%arg0: i32, %arg1: i32, %arg2: i32, %arg3: memref<1x16x128xf32, #tpu.memory_space<vmem>>, %arg4: memref<1x16x128xf32, #tpu.memory_space<vmem>>, %arg5: memref<2x16xbf16, #tpu.memory_space<vmem>>, %arg6: memref<2x16xbf16, #tpu.memory_space<vmem>>, %arg7: memref<16x16xbf16, #tpu.memory_space<vmem>>, %arg8: memref<2x1xf32, #tpu.memory_space<vmem>>, %arg9: memref<2x1xf32, #tpu.memory_space<vmem>>, %arg10: memref<16x1xf32, #tpu.memory_space<vmem>>, %arg11: memref<1xf32, #tpu.memory_space<smem>>, %arg12: memref<1x16x128xf32, #tpu.memory_space<vmem>>, %arg13: memref<1x128xf32, #tpu.memory_space<vmem>>, %arg14: memref<1x128xf32, #tpu.memory_space<vmem>>, %arg15: memref<16x128xf32, #tpu.memory_space<vmem>>) attributes {dimension_semantics = [#tpu.dimension_semantics<parallel>, #tpu.dimension_semantics<parallel>, #tpu.dimension_semantics<arbitrary>], iteration_bounds = array<i64: 2, 2, 2>, scalar_prefetch = 0 : i64, scratch_operands = 3 : i64, tpu.core_type = #tpu.core_type<tc>, window_params = [{transform_indices = @transform_0, window_bounds = array<i64: 1, 16, 128>}, {transform_indices = @transform_1, window_bounds = array<i64: 1, 16, 128>}, {pipeline_mode = #tpu.pipeline_mode<synchronous>, transform_indices = @transform_2, window_bounds = array<i64: 2, 16>}, {pipeline_mode = #tpu.pipeline_mode<synchronous>, transform_indices = @transform_3, window_bounds = array<i64: 2, 16>}, {pipeline_mode = #tpu.pipeline_mode<synchronous>, transform_indices = @transform_4, window_bounds = array<i64: 16, 16>}, {pipeline_mode = #tpu.pipeline_mode<synchronous>, transform_indices = @transform_5, window_bounds = array<i64: 2, 1>}, {pipeline_mode = #tpu.pipeline_mode<synchronous>, transform_indices = @transform_6, window_bounds = array<i64: 2, 1>}, {pipeline_mode = #tpu.pipeline_mode<synchronous>, transform_indices = @transform_7, window_bounds = array<i64: 16, 1>}, {transform_indices = @transform_8, window_bounds = array<i64: 1>}, {transform_indices = @transform_9, window_bounds = array<i64: 1, 16, 128>}]} {
    %c0_i32 = arith.constant 0 : i32
    %0 = arith.cmpi eq, %arg2, %c0_i32 : i32
    %1 = arith.extui %0 : i1 to i32
    %c0_i32_0 = arith.constant 0 : i32
    %2 = arith.cmpi ne, %1, %c0_i32_0 : i32
    scf.if %2 {
      %cst_37 = arith.constant 0xFF800000 : f32
      %53 = vector.broadcast %cst_37 : f32 to vector<1x128xf32>
      %c0_38 = arith.constant 0 : index
      %c0_39 = arith.constant 0 : index
      %54 = vector.load %arg13[%c0_38, %c0_39] : memref<1x128xf32, #tpu.memory_space<vmem>>, vector<1x128xf32>
      tpu.vector_store %arg13[%c0_38, %c0_39], %53 {strides = array<i32>} : memref<1x128xf32, #tpu.memory_space<vmem>>, vector<1x128xf32>,
      %cst_40 = arith.constant 0.000000e+00 : f32
      %55 = vector.broadcast %cst_40 : f32 to vector<1x128xf32>
      %c0_41 = arith.constant 0 : index
      %c0_42 = arith.constant 0 : index
      %56 = vector.load %arg14[%c0_41, %c0_42] : memref<1x128xf32, #tpu.memory_space<vmem>>, vector<1x128xf32>
      tpu.vector_store %arg14[%c0_41, %c0_42], %55 {strides = array<i32>} : memref<1x128xf32, #tpu.memory_space<vmem>>, vector<1x128xf32>,
      %cst_43 = arith.constant 0.000000e+00 : f32
      %57 = vector.broadcast %cst_43 : f32 to vector<16x128xf32>
      %c0_44 = arith.constant 0 : index
      %c0_45 = arith.constant 0 : index
      %58 = vector.load %arg15[%c0_44, %c0_45] : memref<16x128xf32, #tpu.memory_space<vmem>>, vector<16x128xf32>
      tpu.vector_store %arg15[%c0_44, %c0_45], %57 {strides = array<i32>} : memref<16x128xf32, #tpu.memory_space<vmem>>, vector<16x128xf32>,
    } else {
    }
    %c0 = arith.constant 0 : index
    %c0_1 = arith.constant 0 : index
    %c0_2 = arith.constant 0 : index
    %3 = vector.load %arg3[%c0, %c0_1, %c0_2] : memref<1x16x128xf32, #tpu.memory_space<vmem>>, vector<1x16x128xf32>
    %4 = vector.shape_cast %3 : vector<1x16x128xf32> to vector<16x128xf32>
    %5 = arith.truncf %4 : vector<16x128xf32> to vector<16x128xbf16>
    %c0_3 = arith.constant 0 : index
    %c0_4 = arith.constant 0 : index
    %c0_5 = arith.constant 0 : index
    %6 = vector.load %arg4[%c0_3, %c0_4, %c0_5] : memref<1x16x128xf32, #tpu.memory_space<vmem>>, vector<1x16x128xf32>
    %7 = vector.shape_cast %6 : vector<1x16x128xf32> to vector<16x128xf32>
    %8 = arith.truncf %7 : vector<16x128xf32> to vector<16x128xbf16>
    %c0_6 = arith.constant 0 : index
    %c0_7 = arith.constant 0 : index
    %9 = vector.load %arg5[%c0_6, %c0_7] : memref<2x16xbf16, #tpu.memory_space<vmem>>, vector<2x16xbf16>
    %cst = arith.constant dense<0.000000e+00> : vector<2x128xf32>
    %10 = tpu.matmul %9, %5, %cst {dimension_numbers = #tpu.dot_dimension_numbers<[1], [0], [0], [1], [0, 0, 1, 1], [], []>} : vector<2x16xbf16>, vector<16x128xbf16>, vector<2x128xf32> -> vector<2x128xf32>
    %c0_8 = arith.constant 0 : index
    %c0_9 = arith.constant 0 : index
    %11 = vector.load %arg8[%c0_8, %c0_9] : memref<2x1xf32, #tpu.memory_space<vmem>>, vector<2x1xf32>
    %12 = vector.broadcast %11 : vector<2x1xf32> to vector<2x128xf32>
    %13 = arith.addf %10, %12 : vector<2x128xf32>
    %c0_10 = arith.constant 0 : index
    %c0_11 = arith.constant 0 : index
    %14 = vector.load %arg6[%c0_10, %c0_11] : memref<2x16xbf16, #tpu.memory_space<vmem>>, vector<2x16xbf16>
    %cst_12 = arith.constant dense<0.000000e+00> : vector<2x128xf32>
    %15 = tpu.matmul %14, %8, %cst_12 {dimension_numbers = #tpu.dot_dimension_numbers<[1], [0], [0], [1], [0, 0, 1, 1], [], []>} : vector<2x16xbf16>, vector<16x128xbf16>, vector<2x128xf32> -> vector<2x128xf32>
    %c0_13 = arith.constant 0 : index
    %c0_14 = arith.constant 0 : index
    %16 = vector.load %arg9[%c0_13, %c0_14] : memref<2x1xf32, #tpu.memory_space<vmem>>, vector<2x1xf32>
    %17 = vector.broadcast %16 : vector<2x1xf32> to vector<2x128xf32>
    %18 = arith.addf %15, %17 : vector<2x128xf32>
    %c0_15 = arith.constant 0 : index
    %c0_16 = arith.constant 0 : index
    %19 = vector.load %arg7[%c0_15, %c0_16] : memref<16x16xbf16, #tpu.memory_space<vmem>>, vector<16x16xbf16>
    %cst_17 = arith.constant dense<0.000000e+00> : vector<16x128xf32>
    %20 = tpu.matmul %19, %8, %cst_17 {dimension_numbers = #tpu.dot_dimension_numbers<[1], [0], [0], [1], [0, 0, 1, 1], [], []>} : vector<16x16xbf16>, vector<16x128xbf16>, vector<16x128xf32> -> vector<16x128xf32>
    %c0_18 = arith.constant 0 : index
    %c0_19 = arith.constant 0 : index
    %21 = vector.load %arg10[%c0_18, %c0_19] : memref<16x1xf32, #tpu.memory_space<vmem>>, vector<16x1xf32>
    %22 = vector.broadcast %21 : vector<16x1xf32> to vector<16x128xf32>
    %23 = arith.addf %20, %22 : vector<16x128xf32>
    %24 = tpu.transpose %18, [1, 0] : vector<2x128xf32> -> vector<128x2xf32>
    %cst_20 = arith.constant dense<0.000000e+00> : vector<128x128xf32>
    %25 = tpu.matmul %24, %13, %cst_20 {dimension_numbers = #tpu.dot_dimension_numbers<[1], [0], [0], [1], [0, 0, 1, 1], [], []>} : vector<128x2xf32>, vector<2x128xf32>, vector<128x128xf32> -> vector<128x128xf32>
    %c0_21 = arith.constant 0 : index
    %c0_22 = arith.constant 0 : index
    %26 = vector.load %arg13[%c0_21, %c0_22] : memref<1x128xf32, #tpu.memory_space<vmem>>, vector<1x128xf32>
    %cst_23 = arith.constant dense<0xFF800000> : vector<128xf32>
    %27 = vector.multi_reduction <maximumf>, %25, %cst_23 [0] : vector<128x128xf32> to vector<128xf32>
    %28 = vector.shape_cast %27 : vector<128xf32> to vector<1x128xf32>
    %29 = arith.maximumf %26, %28 : vector<1x128xf32>
    %30 = arith.subf %26, %29 : vector<1x128xf32>
    %31 = math.exp %30 : vector<1x128xf32>
    %32 = vector.broadcast %29 : vector<1x128xf32> to vector<128x128xf32>
    %33 = arith.subf %25, %32 : vector<128x128xf32>
    %34 = math.exp %33 : vector<128x128xf32>
    %c0_24 = arith.constant 0 : index
    %c0_25 = arith.constant 0 : index
    %35 = vector.load %arg14[%c0_24, %c0_25] : memref<1x128xf32, #tpu.memory_space<vmem>>, vector<1x128xf32>
    %36 = arith.mulf %31, %35 : vector<1x128xf32>
    %cst_26 = arith.constant dense<0.000000e+00> : vector<128xf32>
    %37 = vector.multi_reduction <add>, %34, %cst_26 [0] : vector<128x128xf32> to vector<128xf32>
    %38 = vector.shape_cast %37 : vector<128xf32> to vector<1x128xf32>
    %39 = arith.addf %36, %38 : vector<1x128xf32>
    %c0_27 = arith.constant 0 : index
    %c0_28 = arith.constant 0 : index
    %40 = vector.load %arg14[%c0_27, %c0_28] : memref<1x128xf32, #tpu.memory_space<vmem>>, vector<1x128xf32>
    tpu.vector_store %arg14[%c0_27, %c0_28], %39 {strides = array<i32>} : memref<1x128xf32, #tpu.memory_space<vmem>>, vector<1x128xf32>,
    %c0_29 = arith.constant 0 : index
    %c0_30 = arith.constant 0 : index
    %41 = vector.load %arg15[%c0_29, %c0_30] : memref<16x128xf32, #tpu.memory_space<vmem>>, vector<16x128xf32>
    %42 = vector.broadcast %31 : vector<1x128xf32> to vector<16x128xf32>
    %43 = arith.mulf %42, %41 : vector<16x128xf32>
    %44 = arith.truncf %23 : vector<16x128xf32> to vector<16x128xbf16>
    %45 = arith.truncf %34 : vector<128x128xf32> to vector<128x128xbf16>
    %cst_31 = arith.constant dense<0.000000e+00> : vector<16x128xf32>
    %46 = tpu.matmul %44, %45, %cst_31 {dimension_numbers = #tpu.dot_dimension_numbers<[1], [0], [0], [1], [0, 0, 1, 1], [], []>} : vector<16x128xbf16>, vector<128x128xbf16>, vector<16x128xf32> -> vector<16x128xf32>
    %47 = arith.addf %43, %46 : vector<16x128xf32>
    %c0_32 = arith.constant 0 : index
    %c0_33 = arith.constant 0 : index
    %48 = vector.load %arg15[%c0_32, %c0_33] : memref<16x128xf32, #tpu.memory_space<vmem>>, vector<16x128xf32>
    tpu.vector_store %arg15[%c0_32, %c0_33], %47 {strides = array<i32>} : memref<16x128xf32, #tpu.memory_space<vmem>>, vector<16x128xf32>,
    %c0_34 = arith.constant 0 : index
    %c0_35 = arith.constant 0 : index
    %49 = vector.load %arg13[%c0_34, %c0_35] : memref<1x128xf32, #tpu.memory_space<vmem>>, vector<1x128xf32>
    tpu.vector_store %arg13[%c0_34, %c0_35], %29 {strides = array<i32>} : memref<1x128xf32, #tpu.memory_space<vmem>>, vector<1x128xf32>,
    %c1_i32 = arith.constant 1 : i32
    %50 = arith.cmpi eq, %arg2, %c1_i32 : i32
    %51 = arith.extui %50 : i1 to i32
    %c0_i32_36 = arith.constant 0 : i32
    %52 = arith.cmpi ne, %51, %c0_i32_36 : i32
    scf.if %52 {
      %c0_37 = arith.constant 0 : index
      %c0_38 = arith.constant 0 : index
      %53 = vector.load %arg14[%c0_37, %c0_38] : memref<1x128xf32, #tpu.memory_space<vmem>>, vector<1x128xf32>
      %54 = tpu.reciprocal %53 {approx = true} : vector<1x128xf32> -> vector<1x128xf32>
      %c0_39 = arith.constant 0 : index
      %c0_40 = arith.constant 0 : index
      %55 = vector.load %arg15[%c0_39, %c0_40] : memref<16x128xf32, #tpu.memory_space<vmem>>, vector<16x128xf32>
      %56 = vector.broadcast %54 : vector<1x128xf32> to vector<16x128xf32>
      %57 = arith.mulf %55, %56 : vector<16x128xf32>
      %c0_41 = arith.constant 0 : index
      %58 = memref.load %arg11[%c0_41] : memref<1xf32, #tpu.memory_space<smem>>
      %59 = vector.broadcast %58 : f32 to vector<16x128xf32>
      %60 = arith.mulf %59, %57 : vector<16x128xf32>
      %c0_42 = arith.constant 0 : index
      %c0_43 = arith.constant 0 : index
      %c0_44 = arith.constant 0 : index
      %61 = vector.load %arg3[%c0_42, %c0_43, %c0_44] : memref<1x16x128xf32, #tpu.memory_space<vmem>>, vector<1x16x128xf32>
      %62 = vector.shape_cast %61 : vector<1x16x128xf32> to vector<16x128xf32>
      %63 = arith.addf %60, %62 : vector<16x128xf32>
      %c0_45 = arith.constant 0 : index
      %c0_46 = arith.constant 0 : index
      %c0_47 = arith.constant 0 : index
      %64 = vector.load %arg12[%c0_45, %c0_46, %c0_47] : memref<1x16x128xf32, #tpu.memory_space<vmem>>, vector<1x16x128xf32>
      %65 = vector.shape_cast %64 : vector<1x16x128xf32> to vector<16x128xf32>
      %66 = vector.shape_cast %63 : vector<16x128xf32> to vector<1x16x128xf32>
      tpu.vector_store %arg12[%c0_45, %c0_46, %c0_47], %66 {strides = array<i32>} : memref<1x16x128xf32, #tpu.memory_space<vmem>>, vector<1x16x128xf32>,
    } else {
    }
    return
  }
  func.func @transform_0(%arg0: i32, %arg1: i32, %arg2: i32) -> (i32, i32, i32) {
    %c0_i32 = arith.constant 0 : i32
    %c0_i32_0 = arith.constant 0 : i32
    return %arg0, %c0_i32, %arg1 : i32, i32, i32
  }
  func.func @transform_1(%arg0: i32, %arg1: i32, %arg2: i32) -> (i32, i32, i32) {
    %c0_i32 = arith.constant 0 : i32
    %c0_i32_0 = arith.constant 0 : i32
    return %arg0, %c0_i32, %arg2 : i32, i32, i32
  }
  func.func @transform_2(%arg0: i32, %arg1: i32, %arg2: i32) -> (i32, i32) {
    %c0_i32 = arith.constant 0 : i32
    %c0_i32_0 = arith.constant 0 : i32
    %c0_i32_1 = arith.constant 0 : i32
    return %c0_i32, %c0_i32_0 : i32, i32
  }
  func.func @transform_3(%arg0: i32, %arg1: i32, %arg2: i32) -> (i32, i32) {
    %c0_i32 = arith.constant 0 : i32
    %c0_i32_0 = arith.constant 0 : i32
    %c0_i32_1 = arith.constant 0 : i32
    return %c0_i32, %c0_i32_0 : i32, i32
  }
  func.func @transform_4(%arg0: i32, %arg1: i32, %arg2: i32) -> (i32, i32) {
    %c0_i32 = arith.constant 0 : i32
    %c0_i32_0 = arith.constant 0 : i32
    %c0_i32_1 = arith.constant 0 : i32
    return %c0_i32, %c0_i32_0 : i32, i32
  }
  func.func @transform_5(%arg0: i32, %arg1: i32, %arg2: i32) -> (i32, i32) {
    %c0_i32 = arith.constant 0 : i32
    %c0_i32_0 = arith.constant 0 : i32
    %c0_i32_1 = arith.constant 0 : i32
    return %c0_i32, %c0_i32_0 : i32, i32
  }
  func.func @transform_6(%arg0: i32, %arg1: i32, %arg2: i32) -> (i32, i32) {
    %c0_i32 = arith.constant 0 : i32
    %c0_i32_0 = arith.constant 0 : i32
    %c0_i32_1 = arith.constant 0 : i32
    return %c0_i32, %c0_i32_0 : i32, i32
  }
  func.func @transform_7(%arg0: i32, %arg1: i32, %arg2: i32) -> (i32, i32) {
    %c0_i32 = arith.constant 0 : i32
    %c0_i32_0 = arith.constant 0 : i32
    %c0_i32_1 = arith.constant 0 : i32
    return %c0_i32, %c0_i32_0 : i32, i32
  }
  func.func @transform_8(%arg0: i32, %arg1: i32, %arg2: i32) -> i32 {
    %c0_i32 = arith.constant 0 : i32
    %c0_i32_0 = arith.constant 0 : i32
    return %c0_i32 : i32
  }
  func.func @transform_9(%arg0: i32, %arg1: i32, %arg2: i32) -> (i32, i32, i32) {
    %c0_i32 = arith.constant 0 : i32
    %c0_i32_0 = arith.constant 0 : i32
    return %arg0, %c0_i32, %arg1 : i32, i32, i32
  }
}

</mosaic_0001>

<bundles_post_ra>
// kernel: tpu_custom_call.1
= control target key start
LH: loop header
LB: loop body
LE: loop exit
PB: predicated region body
PF: predicated region fallthrough
CT: control target
= control target key end

     0   :  { %s1816_s0 = inlined_call_operand.hbm [shape: f32[2,16,256], index: 0, kind: input, shape index: {}]   ;;  %s1817_s1 = inlined_call_operand.hbm [shape: f32[2,16,256], index: 1, kind: input, shape index: {}]   ;;  %s1818_s2 = inlined_call_operand.vmem [shape: bf16[2,16], index: 2, kind: input, shape index: {}]   ;;  %s1819_s3 = inlined_call_operand.vmem [shape: bf16[2,16], index: 3, kind: input, shape index: {}]   ;;  %s1820_s4 = inlined_call_operand.vmem [shape: bf16[16,16], index: 4, kind: input, shape index: {}]   ;;  %s1821_s5 = inlined_call_operand.vmem [shape: f32[2,1], index: 5, kind: input, shape index: {}]   ;;  %s1822_s6 = inlined_call_operand.vmem [shape: f32[2,1], index: 6, kind: input, shape index: {}]   ;;  %s1823_s7 = inlined_call_operand.vmem [shape: f32[16,1], index: 7, kind: input, shape index: {}]   ;;  %s1824_s8 = inlined_call_operand.<no memory space> [shape: f32[1], index: 8, kind: input, shape index: {}]   ;;  %s1825_s9 = inlined_call_operand.hbm [shape: f32[2,16,256], index: 9, kind: output, shape index: {}]  }
   0x1   :  { %1840 = sst [smem:[#allocation24_spill]] %s1816_s0 }
   0x2   :  { %1841 = sst [smem:[#allocation25_spill]] %s1818_s2 }
   0x3   :  { %1842 = sst [smem:[#allocation26_spill]] %s1819_s3 }
   0x4   :  { %1843 = sst [smem:[#allocation27_spill]] %s1820_s4 }
   0x5   :  { %1844 = sst [smem:[#allocation28_spill]] %s1821_s5 }
   0x6   :  { %1845 = sst [smem:[#allocation29_spill]] %s1822_s6 }
   0x7   :  { %1846 = sst [smem:[#allocation30_spill]] %s1823_s7 }
   0x8   :  { %1847 = sst [smem:[#allocation31_spill]] %s1825_s9 }
   0x9   :  { %14 = sst [smem:[#allocation5]] %s1824_s8 }
   0xa   :  { %15 = vsyncpa [#allocation7], 0 }
   0xb   :  { %17 = vsyncpa [#allocation7 + $0x1], 0 }
   0xc   :  { %18 = vsyncpa [#allocation10], 0 }
   0xd   :  { %20 = vsyncpa [#allocation10 + $0x1], 0 }
   0xe   :  { %21 = vsyncpa [#allocation8], 0 }
   0xf   :  { %23 = vsyncpa [#allocation8 + $0x1], 0  ;;  %s1453_s11 = smov 0   ;;  %s1455_s12 = smov 0  }
  0x10   :  { %s1457_s13 = smov 0   ;;  %s1459_s14 = smov 0  }
  0x11   :  { %s1461_s15 = smov 0   ;;  %s1463_s16 = smov 0  }
  0x12   :  { %s1465_s17 = smov 0   ;;  %s1467_s8 = smov 0  }
  0x13   :  { %s1469_s18 = smov 0   ;;  %s1471_s19 = smov 0  }
  0x14   :  { %s1473_s20 = smov 0   ;;  %s1475_s21 = smov 0  }
  0x15   :  { %s1477_s22 = smov 0  }
  0x16 LB: > { %1848 = sst [smem:[#allocation15_spill]] %s1353_s14  ;;  %s967_s23 = sadd.s32 4294967295, %s1389_s22   ;;  %s1389_s22 = sphi %s1477_s22, %s29_s22   ;;  %s1385_s21 = sphi %s1475_s21, %s1902_s21   ;;  %s1381_s20 = sphi %s1473_s20, %s1891_s20   ;;  %s1377_s19 = sphi %s1471_s19, %s1901_s19   ;;  %s1373_s18 = sphi %s1469_s18, %s1900_s18   ;;  %s1369_s8 = sphi %s1467_s8, %s1889_s8   ;;  %s1365_s17 = sphi %s1465_s17, %s1888_s17   ;;  %s1361_s16 = sphi %s1463_s16, %s1899_s16   ;;  %s1357_s15 = sphi %s1461_s15, %s1898_s15   ;;  %s1353_s14 = sphi %s1459_s14, %s1897_s14   ;;  %s1349_s13 = sphi %s1457_s13, %s1896_s13   ;;  %s1345_s12 = sphi %s1455_s12, %s1895_s12   ;;  %s1341_s11 = sphi %s1453_s11, %s1894_s11  }
  0x17   : > { %1849 = sst [smem:[#allocation16_spill]] %s1369_s8  ;;  %s968_s24 = sadd.s32 4294967294, %s1389_s22  }
  0x18   : > { %1850 = sst [smem:[#allocation17_spill]] %s1373_s18  ;;  %p64_p0 = scmp.ne.s32.totalorder %s1361_s16, %s1357_s15 }
  0x19   : > { %1851 = sst [smem:[#allocation18_spill]] %s1377_s19  ;;  %p65_p1 = scmp.eq.s32.totalorder %s1389_s22, 0 }
  0x1a   : > { %1852 = sst [smem:[#allocation19_spill]] %s1381_s20  ;;  %p70_p2 = scmp.ne.s32.totalorder %s1357_s15, %s1353_s14 }
  0x1b   : > { %p1527_p3 = scmp.eq.s32.totalorder %s967_s23, 0  ;;  %p271_p4 = scmp.eq.s32.totalorder %s967_s23, 7 }
  0x1c   : > { %p1533_p5 = por %p65_p1, %p64_p0  ;;  %p277_p6 = scmp.eq.s32.totalorder %s968_s24, 7 }
  0x1d   : > { %p1539_p7 = por %p1527_p3, %p70_p2  ;;  %p1543_p8 = por %p271_p4, %p64_p0 }
  0x1e   : > { %p1547_p9 = por %p277_p6, %p70_p2  ;;  %p1032_p10 = scmp.lt.s32.totalorder %s1389_s22, 8 }
  0x1f   : > { %s1856_s30 = scalar_select %p1543_p8, 1, 0 }
  0x20   : > { %s1858_s10 = scalar_select %p1547_p9, 1, 0 }
  0x21   : > { %1857 = sst [smem:[#allocation20_spill]] %s1856_s30  ;;  %s318_s23 = sand.u32 1, %s1361_s16  }
  0x22   : > { %1859 = sst [smem:[#allocation21_spill]] %s1858_s10  ;;  %s971_s26 = sshll.u32 %s318_s23, 4 }
  0x23   : > { %s1831_s25 = sshll.u32 %s1385_s21, 2  ;;  %s322_s14 = scalar_lea.vmem [#allocation6], %s971_s26 }
  0x24   : > { %s326_s24 = sadd.s32 %s1381_s20, %s1831_s25  ;;  %s331_s9 = sshll.u32 %s322_s14, 4  ;;  %s332_s9 = int_to_ptr.vmem [resolvable:$true] %s331_s9 }
  0x25   : > { %s973_s8 = sshll.u32 %s326_s24, 3  ;;  %s1860_s0 = sld [smem:[#allocation24_spill]] }
  0x26   : > { %p1022_p11 = pnand %p1032_p10, %p1533_p5  ;;  %s319_s26 = scalar_lea.sflag [#allocation7], %s318_s23 }
  0x27   : > { %s1832_s14 = smov 256   ;;  %s1833_s24 = smov 128  }
  0x28   : > { %s1834_s25 = smov 8   ;;  %p977_p12 = scmp.ge.s32.totalorder %s1389_s22, 1 }
  0x29   : > { %p362_p13 = scmp.lt.s32.totalorder %s1389_s22, 9  ;;  %s41_s18 = sadd.s32 1, %s1377_s19 }
  0x2a   : > { %p42_p2 = scmp.ge.s32.totalorder %s41_s18, 2  ;;  %p98_p4 = scmp.ne.s32.totalorder %s1345_s12, %s1341_s11 }
  0x2b   : > { %s328_s2 = scalar_lea.hbm %s1860_s0, %s973_s8  ;;  %p1570_p0 = pnand %p977_p12, %p362_p13 }
  0x2c   : > { %s329_s10 = sshll.u32 %s328_s2, 4  ;;  %s1904_s18 = smov (%p42_p2, %s41_s18), 0  ;;  %s330_s10 = int_to_ptr.hbm [resolvable:$true] %s329_s10 }
  0x2d   : > { %1024 = dma.hbm_to_vmem [thread:$0]  (!%p1022_p11), %s330_s10, 256, %s332_s9, %s319_s26, %s1832_s14, %s1833_s24, %s1834_s25  }
  0x2e   : > { %1862 = sst [smem:[#allocation22_spill]] %s1904_s18  ;;  %s1863_s9 = sadd.s32 1, %s1381_s20 }
  0x2f   : > { %s1906_s9 = smov (!%p42_p2, %s1863_s9), %s1381_s20  ;;  %s81_s30 = ssub.s32 %s1377_s19, %s1904_s18 }
  0x30   : > { %p92_p5 = scmp.ne.s32.totalorder %s1349_s13, %s1345_s12  ;;  %p46_p6 = scmp.ge.s32.totalorder %s1906_s9, 2 }
  0x31   : > { %p1589_p11 = por %p98_p4, %p1527_p3  ;;  %s341_s23 = sand.u32 1, %s1349_s13  }
  0x32   : > { %s1865_s26 = sshll.u32 %s1385_s21, 2  ;;  %s1908_s9 = smov (%p46_p6, %s1906_s9), 0 }
  0x33   : > { %s349_s14 = sadd.s32 %s1377_s19, %s1865_s26  ;;  %1866 = sst [smem:[#allocation23_spill]] %s1908_s9 }
  0x34   : > { %s1867_s11 = sadd.s32 1, %s1385_s21  ;;  %s53_s24 = ssub.s32 %s1381_s20, %s1908_s9 }
  0x35   : > { %s1910_s11 = smov (!%p46_p6, %s1867_s11), %s1385_s21  ;;  %p1606_p12 = por %p92_p5, %p65_p1 }
  0x36   : > { %p50_p3 = scmp.ge.s32.totalorder %s1910_s11, 2  ;;  %s974_s27 = sshll.u32 %s341_s23, 4 }
  0x37   : > { %s976_s26 = sshll.u32 %s349_s14, 3  ;;  %s345_s7 = scalar_lea.vmem [#allocation9], %s974_s27 }
  0x38   : > { %s1912_s11 = smov (%p50_p3, %s1910_s11), 0  ;;  %s351_s0 = scalar_lea.hbm %s1817_s1, %s976_s26 }
  0x39   : > { %s52_s9 = ssub.s32 %s1385_s21, %s1912_s11  ;;  %s352_s18 = sshll.u32 %s351_s0, 4  ;;  %s353_s18 = int_to_ptr.hbm [resolvable:$true] %s352_s18 }
  0x3a   : > { %s54_s20 = sor.u32 %s53_s24, %s52_s9  ;;  %s82_s19 = sor.u32 %s81_s30, %s52_s9 }
  0x3b   : > { %p55_p1 = scmp.eq.s32.totalorder %s54_s20, 0  ;;  %p83_p13 = scmp.eq.s32.totalorder %s82_s19, 0 }
  0x3c   : > { %s354_s4 = sshll.u32 %s345_s7, 4  ;;  %s1869_s5 = sadd.s32 1, %s1361_s16  ;;  %s355_s4 = int_to_ptr.vmem [resolvable:$true] %s354_s4 }
  0x3d   : > { %s1620_s3 = scalar_select %p55_p1, %s1361_s16, %s1869_s5  }
  0x3e   : > { %s1870_s14 = sadd.s32 1, %s1349_s13  ;;  %p1025_p2 = pnand %p1032_p10, %p1606_p12 }
  0x3f   : > { %s1625_s6 = scalar_select %p83_p13, %s1349_s13, %s1870_s14  }
  0x40   : > { %s342_s2 = scalar_lea.sflag [#allocation10], %s341_s23  ;;  %s1871_s28 = smov 8  }
  0x41   : > { %s1872_s0 = smov 128   ;;  %s1873_s24 = smov 256  }
  0x42   : > { %1027 = dma.hbm_to_vmem [thread:$0]  (!%p1025_p2), %s353_s18, 256, %s355_s4, %s342_s2, %s1873_s24, %s1872_s0, %s1871_s28  }
  0x43   : > { %366 = sbr.rel (%p1570_p0) target bundleno = 901 (0x385), region = 56  ;;  %s1637_s7 = sand.u32 (!%p1570_p0), 1, %s1357_s15  }
  0x44   : > { %s978_s5 = sshll.u32 (!%p1570_p0), %s1637_s7, 4  ;;  %s369_s19 = scalar_lea.sflag (!%p1570_p0), [#allocation7], %s1637_s7 }
  0x45   : > { %s1641_s20 = scalar_lea.vmem (!%p1570_p0), [#allocation6], %s978_s5 }
  0x48   : > { %1328 = dma.done.wait (%p1539_p7), %s369_s19, 256  }
  0x49   : > { %1330 = vsyncadd (%p1539_p7), %s369_s19, 4294967040  ;;  %s378_s4 = sand.u32 1, %s1345_s12  }
  0x4a   : > { %s979_s25 = sshll.u32 %s378_s4, 4  ;;  %s379_s8 = scalar_lea.sflag [#allocation10], %s378_s4 }
  0x4b   : > { %s382_s18 = scalar_lea.vmem [#allocation9], %s979_s25 }
  0x4c   : > { %1332 = dma.done.wait (%p1589_p11), %s379_s8, 256  }
  0x4d   : > { %1334 = vsyncadd (%p1589_p11), %s379_s8, 4294967040  ;;  %s1652_s9 = scalar_lea.vmem [#allocation11], %s978_s5  ;;  %p981_p10 = scmp.ne.s32.totalorder %s1365_s17, 0 }
  0x4f   : > { %427 = sbr.rel (%p981_p10) target bundleno = 89 (0x59), region = 68 }
  0x54   : > { %v1394_v0 = vmov -inf   ;;  %v1395_v1 = vmov 0.0  }
  0x55   : > { %428 = vst [vmem:[#allocation2] sm:$0x1] %v1394_v0 }
  0x56   : > { %429 = vst [vmem:[#allocation3] sm:$0x1] %v1395_v1 }
  0x57   : > { %430 = vst [vmem:[#allocation4] sm:$0xff] %v1395_v1 }
  0x58   : > { %431 = vst [vmem:[#allocation4 + $0x8] sm:$0xff] %v1395_v1 }
  0x59 PF: > { %v435_v2 = vld [vmem:[%s382_s18] sm:$0xff]  ;;  %v436_v3 = vld [vmem:[%s382_s18 + $0x8] sm:$0xff]  ;;  %v1396_v5 = vmov 0   ;;  %s1874_s10 = sld [smem:[#allocation29_spill]]  ;;  %vm445_vm0 = vcmask 130048   ;;  %vm602_vm1 = vcmask 1041408  }
  0x5a   : > { %v437_v4 = vpack.c.bf16 %v436_v3, %v435_v2  ;;  %1148 = vset.pattern.permute.xlu0 %v1396_v5  ;;  %1149 = vset.pattern.permute.xlu1 %v1396_v5  ;;  %s1875_s26 = sld [smem:[#allocation26_spill]]  ;;  %v432_v8 = vld [vmem:[%s1641_s20] sm:$0xff]  ;;  %v433_v9 = vld [vmem:[%s1641_s20 + $0x8] sm:$0xff]  ;;  %vm553_vm2 = vcmask 15360   ;;  %p1006_p7 = scmp.ne.s32.totalorder %s1365_s17, 1 }
  0x5b   : > { %1150 = vset.pattern.permute.xlu2 %v1396_v5  ;;  %v434_v10 = vpack.c.bf16 %v433_v9, %v432_v8  ;;  %s1876_s28 = sld [smem:[#allocation28_spill]] }
  0x5c   : > { %479 = vmatpush.bf16.msra.mxu1 %v437_v4  ;;  %514 = vmatpush.bf16.msra.mxu2 %v437_v4  ;;  %s1877_s5 = sld [smem:[#allocation27_spill]] }
  0x5d   : > { %s1878_s25 = sld [smem:[#allocation30_spill]]  ;;  %456 = vmatpush.bf16.msra.mxu0 %v434_v10 }
  0x5e   : > { %s1879_s29 = sld [smem:[#allocation25_spill]] }
  0x5f   : > { %v463_v6 = vld [vmem:[%s1874_s10] sm:$0x3]  ;;  %s821_s23 = sld [smem:[#allocation5]] (!%p1006_p7) }
  0x60   : > { %466 = vperm.xlu0 %1148, %v463_v6   ;;  %v462_v7 = vld [vmem:[%s1875_s26] sm:$0x1] }
  0x61   : > { %983 = vmatmul.msk.bf16.vlgmr.msra.gmra.mxu1 %vm445_vm0, %v462_v7  ;;  %v439_v11 = vld [vmem:[%s1876_s28] sm:$0x3] }
  0x62   : > { %v1012_v12 = vld [vmem:[%s1877_s5] sm:$0xff]  ;;  %442 = vperm.xlu1 %1149, %v439_v11  }
  0x63   : > { %v488_v13 = vld [vmem:[%s1878_s25 + $0x8] sm:$0xff]  ;;  %988 = vmatmul.msk.bf16.vlgmr.msra.gmra.mxu2 %vm445_vm0, %v1012_v12  ;;  %v487_v15 = vld [vmem:[%s1878_s25] sm:$0xff] }
  0x64   : > { %v438_v14 = vld [vmem:[%s1879_s29] sm:$0x1]  ;;  %496 = vperm.xlu2 %1150, %v488_v13  }
  0x65   : > { %982 = vmatmul.msk.bf16.vlgmr.msra.gmra.mxu0 %vm445_vm0, %v438_v14  ;;  %v1716_v14 = vld [vmem:[#allocation2] sm:$0x1] }
  0x6a   : > { %491 = vperm.xlu1 %1149, %v487_v15  }
  0xd2   : > { %v467_v16 = vpop.permute.xlu0 %466 }
  0xd4   : > { %v443_v22 = vpop.permute.xlu1 %442 }
  0xde   : > { %v481_v17 = vpop.f32.mrf.mxu1 }
  0xdf   : > { %v482_v18 = vadd.f32 %v481_v17, %v467_v16 }
  0xe1   : > { %521 = vxpose.xlu0.b32.start.end [1/1] (short) %v482_v18, 128 }
  0xe2   : > { %v458_v20 = vpop.f32.mrf.mxu0 }
  0xe3   : > { %v459_v23 = vadd.f32 %v458_v20, %v443_v22 }
  0xe5   : > { %989 = vmatpush.msk.msrb.mxu1 %vm602_vm1, %v459_v23  ;;  %1013 = vmatpush.msk.msrb.mxu2 %vm602_vm1, %v459_v23 }
  0xe6   : > { %v483_v19 = vpop.f32.mrf.mxu1  ;;  %1014 = vmatpush.msk.msra.mxu3 %vm602_vm1, %v459_v23  ;;  %v1694_v40 = vpop.f32.mrf.mxu2 }
  0xea   : > { %v460_v21 = vpop.f32.mrf.mxu0 }
  0xee   : > { %v1698_v43 = vpop.f32.mrf.mxu2 }
 0x185   : > { %v537_v24 = vpop.trf.xlu0 }
 0x186   : > { %990 = vmatmul.msk.f32.vlgmr.msrb.gmra.mxu1 %vm553_vm2, %v537_v24 }
 0x18d   : > { %v538_v25 = vpop.trf.xlu0 }
 0x18e   : > { %991 = vmatmul.msk.f32.gmra.mxu1 %vm553_vm2, %v538_v25 }
 0x195   : > { %v539_v26 = vpop.trf.xlu0 }
 0x196   : > { %992 = vmatmul.msk.f32.gmra.mxu1 %vm553_vm2, %v539_v26 }
 0x19d   : > { %v540_v27 = vpop.trf.xlu0 }
 0x19e   : > { %993 = vmatmul.msk.f32.gmra.mxu1 %vm553_vm2, %v540_v27 }
 0x1a5   : > { %v541_v28 = vpop.trf.xlu0 }
 0x1a6   : > { %994 = vmatmul.msk.f32.gmra.mxu1 %vm553_vm2, %v541_v28 }
 0x1ad   : > { %v542_v29 = vpop.trf.xlu0 }
 0x1ae   : > { %995 = vmatmul.msk.f32.vlgmr.msrb.gmra.mxu2 %vm553_vm2, %v542_v29 }
 0x1b5   : > { %v543_v30 = vpop.trf.xlu0 }
 0x1b6   : > { %996 = vmatmul.msk.f32.gmra.mxu2 %vm553_vm2, %v543_v30 }
 0x1bd   : > { %v544_v31 = vpop.trf.xlu0 }
 0x1be   : > { %997 = vmatmul.msk.f32.gmra.mxu2 %vm553_vm2, %v544_v31 }
 0x1c5   : > { %v545_v32 = vpop.trf.xlu0 }
 0x1c6   : > { %998 = vmatmul.msk.f32.gmra.mxu2 %vm553_vm2, %v545_v32 }
 0x1cd   : > { %v546_v33 = vpop.trf.xlu0 }
 0x1ce   : > { %999 = vmatmul.msk.f32.vlgmr.msra.gmra.mxu3 %vm553_vm2, %v546_v33 }
 0x1d5   : > { %v547_v34 = vpop.trf.xlu0 }
 0x1d6   : > { %1000 = vmatmul.msk.f32.gmra.mxu3 %vm553_vm2, %v547_v34 }
 0x1dd   : > { %v548_v35 = vpop.trf.xlu0 }
 0x1de   : > { %1001 = vmatmul.msk.f32.gmra.mxu3 %vm553_vm2, %v548_v35 }
 0x1e5   : > { %v549_v36 = vpop.trf.xlu0 }
 0x1e6   : > { %1002 = vmatmul.msk.f32.gmra.mxu3 %vm553_vm2, %v549_v36 }
 0x1ed   : > { %v550_v37 = vpop.trf.xlu0 }
 0x1ee   : > { %1003 = vmatmul.msk.f32.gmra.mxu3 %vm553_vm2, %v550_v37 }
 0x1f5   : > { %v551_v38 = vpop.trf.xlu0 }
 0x1f6   : > { %1004 = vmatmul.msk.f32.gmra.mxu3 %vm553_vm2, %v551_v38 }
 0x1fd   : > { %v552_v39 = vpop.trf.xlu0 }
 0x1fe   : > { %1005 = vmatmul.msk.f32.gmra.mxu3 %vm553_vm2, %v552_v39 }
 0x203   : > { %v623_v42 = vpop.f32.mrf.mxu1 }
 0x20b   : > { %v626_v45 = vpop.f32.mrf.mxu1 }
 0x213   : > { %v629_v48 = vpop.f32.mrf.mxu1 }
 0x21b   : > { %v632_v51 = vpop.f32.mrf.mxu1 }
 0x223   : > { %v635_v55 = vpop.f32.mrf.mxu1 }
 0x224   : > { %v672_v58 = vmax.f32 %v623_v42, %v635_v55 }
 0x231   : > { %v638_v46 = vpop.f32.mrf.mxu2 }
 0x232   : > { %v673_v56 = vmax.f32 %v626_v45, %v638_v46 }
 0x239   : > { %v641_v49 = vpop.f32.mrf.mxu2 }
 0x23a   : > { %v674_v59 = vmax.f32 %v629_v48, %v641_v49 }
 0x241   : > { %v644_v53 = vpop.f32.mrf.mxu2 }
 0x242   : > { %v675_v60 = vmax.f32 %v632_v51, %v644_v53 }
 0x249   : > { %v647_v57 = vpop.f32.mrf.mxu2 }
 0x24a   : > { %v676_v62 = vmax.f32 %v672_v58, %v647_v57 }
 0x251   : > { %v1696_v41 = vpop.f32.mrf.mxu3 }
 0x252   : > { %v677_v61 = vmax.f32 %v673_v56, %v1696_v41 }
 0x259   : > { %v1700_v44 = vpop.f32.mrf.mxu3 }
 0x25a   : > { %v678_v63 = vmax.f32 %v674_v59, %v1700_v44 }
 0x261   : > { %v1702_v47 = vpop.f32.mrf.mxu3 }
 0x262   : > { %v679_v0 = vmax.f32 %v675_v60, %v1702_v47 }
 0x269   : > { %v1704_v50 = vpop.f32.mrf.mxu3 }
 0x26a   : > { %v680_v3 = vmax.f32 %v676_v62, %v1704_v50 }
 0x271   : > { %v1706_v52 = vpop.f32.mrf.mxu3 }
 0x272   : > { %v681_v1 = vmax.f32 %v677_v61, %v1706_v52 }
 0x274   : > { %v684_v6 = vmax.f32 %v680_v3, %v681_v1 }
 0x279   : > { %v1708_v54 = vpop.f32.mrf.mxu3 }
 0x27a   : > { %v682_v4 = vmax.f32 %v678_v63, %v1708_v54 }
 0x281   : > { %v668_v2 = vpop.f32.mrf.mxu3 }
 0x282   : > { %v683_v5 = vmax.f32 %v679_v0, %v668_v2 }
 0x284   : > { %v685_v7 = vmax.f32 %v682_v4, %v683_v5 }
 0x286   : > { %v686_v8 = vmax.f32 %v684_v6, %v685_v7 }
 0x288   : > { %v687_v9 = vrot.slane %v686_v8, 4 }
 0x28a   : > { %v688_v10 = vmax.f32 %v686_v8, %v687_v9 }
 0x28c   : > { %v689_v11 = vrot.slane %v688_v10, 2 }
 0x28e   : > { %v690_v12 = vmax.f32 %v688_v10, %v689_v11 }
 0x290   : > { %v691_v13 = vrot.slane %v690_v12, 1 }
 0x292   : > { %v692_v15 = vmax.f32 %v690_v12, %v691_v13 }
 0x294   : > { %v1719_v16 = vmax.f32 %v1716_v14, %v692_v15 }
 0x296   : > { %v698_v17 = vperm.slane %v1719_v16, 0  ;;  %807 = vst [vmem:[#allocation2] sm:$0x1] %v1719_v16 }
 0x298   : > { %v700_v18 = vsub.f32 %v623_v42, %v698_v17  ;;  %v701_v19 = vsub.f32 %v626_v45, %v698_v17  ;;  %v702_v20 = vsub.f32 %v629_v48, %v698_v17  ;;  %v703_v21 = vsub.f32 %v632_v51, %v698_v17 }
 0x299   : > { %v704_v22 = vsub.f32 %v635_v55, %v698_v17  ;;  %v705_v25 = vsub.f32 %v638_v46, %v698_v17  ;;  %v706_v27 = vsub.f32 %v641_v49, %v698_v17  ;;  %v707_v28 = vsub.f32 %v644_v53, %v698_v17 }
 0x29a   : > { %v716_v23 = vmul.f32 1.442695, %v700_v18  ;;  %v718_v24 = vmul.f32 1.442695, %v701_v19  ;;  %v720_v26 = vmul.f32 1.442695, %v702_v20  ;;  %v710_v30 = vsub.f32 %v1700_v44, %v698_v17 }
 0x29b   : > { %v722_v29 = vmul.f32 1.442695, %v703_v21  ;;  %v724_v31 = vmul.f32 1.442695, %v704_v22  ;;  %v711_v32 = vsub.f32 %v1702_v47, %v698_v17  ;;  %v726_v33 = vmul.f32 1.442695, %v705_v25 }
 0x29c   : > { %1151 = vpow2.f32 %v716_v23  ;;  %v708_v34 = vsub.f32 %v647_v57, %v698_v17  ;;  %v728_v35 = vmul.f32 1.442695, %v706_v27  ;;  %v709_v36 = vsub.f32 %v1696_v41, %v698_v17 }
 0x29d   : > { %1153 = vpow2.f32 %v718_v24  ;;  %v730_v37 = vmul.f32 1.442695, %v707_v28  ;;  %v714_v39 = vsub.f32 %v1708_v54, %v698_v17  ;;  %v736_v42 = vmul.f32 1.442695, %v710_v30 }
 0x29e   : > { %1155 = vpow2.f32 %v720_v26  ;;  %v715_v44 = vsub.f32 %v668_v2, %v698_v17  ;;  %v738_v46 = vmul.f32 1.442695, %v711_v32  ;;  %v712_v47 = vsub.f32 %v1704_v50, %v698_v17 }
 0x29f   : > { %1157 = vpow2.f32 %v722_v29  ;;  %v732_v48 = vmul.f32 1.442695, %v708_v34  ;;  %v713_v51 = vsub.f32 %v1706_v52, %v698_v17  ;;  %v734_v53 = vmul.f32 1.442695, %v709_v36  ;;  %v748_v34 = vld [vmem:[#allocation3] sm:$0x1] }
 0x2a0   : > { %1159 = vpow2.f32 %v724_v31  ;;  %v744_v54 = vmul.f32 1.442695, %v714_v39  ;;  %v746_v57 = vmul.f32 1.442695, %v715_v44  ;;  %v740_v50 = vmul.f32 1.442695, %v712_v47 }
 0x2a1   : > { %1161 = vpow2.f32 %v726_v33  ;;  %v742_v61 = vmul.f32 1.442695, %v713_v51  ;;  %v694_v21 = vsub.f32 %v1716_v14, %v1719_v16  ;;  %v492_v14 = vpop.permute.xlu1 %491  ;;  %v773_v51 = vld [vmem:[#allocation4] sm:$0xff] }
 0x2a2   : > { %v1726_v38 = vpop.eup %1151  ;;  %1163 = vpow2.f32 %v728_v35  ;;  %v497_v35 = vpop.permute.xlu2 %496 }
 0x2a3   : > { %v1729_v45 = vpop.eup %1153  ;;  %1165 = vpow2.f32 %v730_v37  ;;  %v695_v25 = vmul.f32 1.442695, %v694_v21  ;;  %v519_v44 = vadd.f32 %v1698_v43, %v497_v35 }
 0x2a4   : > { %v750_v41 = vadd.f32 %v1729_v45, %v1726_v38  ;;  %v1734_v49 = vpop.eup %1155  ;;  %1167 = vpow2.f32 %v736_v42  ;;  %v517_v42 = vadd.f32 %v1694_v40, %v492_v14 }
 0x2a5   : > { %v1158_v56 = vpop.eup %1157  ;;  %1169 = vpow2.f32 %v738_v46  ;;  %v781_v46 = vpack.c.bf16 %v1729_v45, %v1726_v38 }
 0x2a6   : > { %v751_v55 = vadd.f32 %v1734_v49, %v750_v41  ;;  %v1160_v58 = vpop.eup %1159  ;;  %1171 = vpow2.f32 %v732_v48  ;;  %v782_v36 = vpack.c.bf16 %v1158_v56, %v1734_v49  ;;  %v780_v48 = vpack.c.bf16 %v519_v44, %v517_v42 }
 0x2a7   : > { %v1162_v60 = vpop.eup %1161  ;;  %1173 = vpow2.f32 %v734_v53 }
 0x2a8   : > { %v752_v59 = vadd.f32 %v1158_v56, %v751_v55  ;;  %v1164_v62 = vpop.eup %1163  ;;  %1175 = vpow2.f32 %v744_v54  ;;  %v783_v31 = vpack.c.bf16 %v1162_v60, %v1160_v58  ;;  %v774_v55 = vld [vmem:[#allocation4 + $0x8] sm:$0xff] }
 0x2a9   : > { %v1166_v52 = vpop.eup %1165  ;;  %1177 = vpow2.f32 %v746_v57 }
 0x2aa   : > { %v753_v63 = vadd.f32 %v1160_v58, %v752_v59  ;;  %v1168_v0 = vpop.eup %1167  ;;  %1179 = vpow2.f32 %v740_v50  ;;  %v784_v28 = vpack.c.bf16 %v1166_v52, %v1164_v62 }
 0x2ab   : > { %v1170_v2 = vpop.eup %1169  ;;  %1181 = vpow2.f32 %v742_v61 }
 0x2ac   : > { %v754_v1 = vadd.f32 %v1162_v60, %v753_v63  ;;  %v1172_v3 = vpop.eup %1171  ;;  %v786_v5 = vpack.c.bf16 %v1170_v2, %v1168_v0  ;;  %1183 = vpow2.f32 %v695_v25 }
 0x2ad   : > { %v1174_v6 = vpop.eup %1173 }
 0x2ae   : > { %v755_v4 = vadd.f32 %v1164_v62, %v754_v1  ;;  %v1176_v7 = vpop.eup %1175  ;;  %v785_v24 = vpack.c.bf16 %v1174_v6, %v1172_v3 }
 0x2af   : > { %v1178_v9 = vpop.eup %1177 }
 0x2b0   : > { %v756_v8 = vadd.f32 %v1166_v52, %v755_v4  ;;  %v1180_v10 = vpop.eup %1179  ;;  %v788_v12 = vpack.c.bf16 %v1178_v9, %v1176_v7 }
 0x2b1   : > { %v1182_v13 = vpop.eup %1181 }
 0x2b2   : > { %v757_v11 = vadd.f32 %v1172_v3, %v756_v8  ;;  %789 = vmatpush.bf16.msrb.mxu0 %v788_v12  ;;  %v787_v18 = vpack.c.bf16 %v1182_v13, %v1180_v10  ;;  %v1184_v33 = vpop.eup %1183 }
 0x2b3   : > { %v749_v39 = vmul.f32 %v1184_v33, %v748_v34  ;;  %v776_v41 = vperm.slane %v1184_v33, 0 }
 0x2b4   : > { %v758_v15 = vadd.f32 %v1174_v6, %v757_v11 }
 0x2b5   : > { %v778_v53 = vmul.f32 %v776_v41, %v773_v51  ;;  %v779_v56 = vmul.f32 %v776_v41, %v774_v55 }
 0x2b6   : > { %v759_v17 = vadd.f32 %v1168_v0, %v758_v15  ;;  %790 = vmatpush.bf16.msrb.mxu0 %v787_v18 }
 0x2b8   : > { %v760_v19 = vadd.f32 %v1170_v2, %v759_v17 }
 0x2ba   : > { %v761_v20 = vadd.f32 %v1180_v10, %v760_v19  ;;  %791 = vmatpush.bf16.msrb.mxu0 %v786_v5 }
 0x2bc   : > { %v762_v22 = vadd.f32 %v1182_v13, %v761_v20 }
 0x2be   : > { %v763_v23 = vadd.f32 %v1176_v7, %v762_v22  ;;  %792 = vmatpush.bf16.msrb.mxu0 %v785_v24 }
 0x2c0   : > { %v764_v26 = vadd.f32 %v1178_v9, %v763_v23 }
 0x2c2   : > { %v765_v27 = vrot.slane %v764_v26, 4  ;;  %793 = vmatpush.bf16.msrb.mxu0 %v784_v28 }
 0x2c4   : > { %v766_v29 = vadd.f32 %v765_v27, %v764_v26 }
 0x2c6   : > { %v767_v30 = vrot.slane %v766_v29, 2  ;;  %794 = vmatpush.bf16.msrb.mxu0 %v783_v31 }
 0x2c8   : > { %v768_v32 = vadd.f32 %v767_v30, %v766_v29 }
 0x2ca   : > { %v769_v16 = vrot.slane %v768_v32, 1  ;;  %795 = vmatpush.bf16.msrb.mxu0 %v782_v36 }
 0x2cc   : > { %v770_v37 = vadd.f32 %v769_v16, %v768_v32 }
 0x2ce   : > { %v771_v47 = vadd.f32 %v770_v37, %v749_v39  ;;  %796 = vmatpush.bf16.msrb.mxu0 %v781_v46 }
 0x2d0   : > { %772 = vst [vmem:[#allocation3] sm:$0x1] %v771_v47 }
 0x2d1   : > { %797 = vmatmul.bf16.vlgmr.msrb.gmra.mxu0 %v780_v48 }
 0x34e   : > { %v798_v54 = vpop.f32.mrf.mxu0 }
 0x34f   : > { %v803_v49 = vadd.f32 %v798_v54, %v778_v53 }
 0x351   : > { %805 = vst [vmem:[#allocation4] sm:$0xff] %v803_v49 }
 0x355   : > { %811 = sbr.rel (%p1006_p7) target bundleno = 876 (0x36c), region = 72 }
 0x356   : > { %v800_v57 = vpop.f32.mrf.mxu0 }
 0x357   : > { %v804_v40 = vadd.f32 %v800_v57, %v779_v56 }
 0x359   : > { %806 = vst [vmem:[#allocation4 + $0x8] sm:$0xff] %v804_v40 }
 0x35a   : > { %v812_v43 = vld [vmem:[#allocation3] sm:$0x1]  ;;  %v814_v45 = vld [vmem:[#allocation4] sm:$0xff]  ;;  %v822_v59 = vstv %s821_s23 }
 0x35b   : > { %1185 = vrcp.f32 %v812_v43  ;;  %v825_v62 = vld [vmem:[%s1641_s20] sm:$0xff]  ;;  %v826_v63 = vld [vmem:[%s1641_s20 + $0x8] sm:$0xff] }
 0x360   : > { %v815_v58 = vld [vmem:[#allocation4 + $0x8] sm:$0xff] }
 0x361   : > { %v1186_v38 = vpop.eup %1185 }
 0x362   : > { %v817_v50 = vperm.slane %v1186_v38, 0 }
 0x364   : > { %v819_v60 = vmul.f32 %v817_v50, %v814_v45  ;;  %v820_v61 = vmul.f32 %v817_v50, %v815_v58 }
 0x366   : > { %v823_v52 = vmul.f32 %v822_v59, %v819_v60  ;;  %v824_v0 = vmul.f32 %v822_v59, %v820_v61 }
 0x368   : > { %v827_v1 = vadd.f32 %v825_v62, %v823_v52  ;;  %v828_v2 = vadd.f32 %v826_v63, %v824_v0 }
 0x36a   : > { %829 = vst [vmem:[%s1652_s9] sm:$0xff] %v827_v1 }
 0x36b   : > { %830 = vst [vmem:[%s1652_s9 + $0x8] sm:$0xff] %v828_v2 }
 0x36c PF: > { %s1880_s17 = sld [smem:[#allocation17_spill]]  ;;  %s845_s28 = sshll.u32 %s1652_s9, 4  ;;  %s846_s28 = int_to_ptr.vmem [resolvable:$true] %s845_s28 }
 0x36d   : > { %s1881_s27 = sld [smem:[#allocation16_spill]]  ;;  %s832_s18 = scalar_lea.sflag [#allocation8], %s1637_s7 }
 0x36e   : > { %s1883_s20 = sld [smem:[#allocation31_spill]] }
 0x372   : > { %s1008_s14 = sshll.u32 %s1880_s17, 2 }
 0x373   : > { %s842_s2 = sadd.s32 %s1881_s27, %s1008_s14 }
 0x374   : > { %s1009_s0 = sshll.u32 %s842_s2, 3  ;;  %s1884_s4 = smov %s1883_s20 }
 0x375   : > { %s844_s19 = scalar_lea.hbm %s1883_s20, %s1009_s0  ;;  %s1267_s9 = scalar_lea.hbm %s1884_s4, 64 }
 0x376   : > { %s847_s8 = sshll.u32 %s844_s19, 4  ;;  %s848_s8 = int_to_ptr.hbm [resolvable:$true] %s847_s8 }
 0x377   : > { %s1261_s29 = sshra.s32 %s848_s8, 4  ;;  %s1262_s29 = int_to_ptr.hbm [resolvable:$true] %s1261_s29 }
 0x378   : > { %s1263_s30 = scalar_lea.hbm %s1262_s29, 16  ;;  %p1268_p6 = scmp.lt.s32.totalorder %s1262_s29, %s1884_s4 }
 0x379   : > { %p1264_p0 = scmp.ne.s32.totalorder %s1262_s29, %s1263_s30  ;;  %p1269_p11 = scmp.lt.s32.totalorder %s1267_s9, %s1263_s30 }
 0x37b   : > { %p1265_p4 = pnand %p1264_p0, %p1543_p8  ;;  %p1270_p12 = por %p1269_p11, %p1268_p6 }
 0x37d   : > { %p1266_p5 = pneg %p1265_p4 }
 0x37f   : > { %p1271_p3 = pnand %p1270_p12, %p1266_p5 }
 0x381   : > { %1274 = shalt.err (!%p1271_p3)
}
 0x382   : > { %s1397_s7 = smov 128   ;;  %s1398_s14 = smov 256  }
 0x383   : > { %s1399_s2 = smov 8  }
 0x384   : > { %1019 = dma.vmem_to_hbm [thread:$0]  (%p1543_p8), %s846_s28, 256, %s848_s8, %s832_s18, %s1397_s7, %s1398_s14, %s1399_s2  }
 0x385 PF: > { %s1885_s0 = sld [smem:[#allocation15_spill]]  ;;  %p1033_p1 = scmp.ge.s32.totalorder %s1389_s22, 2 }
 0x387   : > { %p1029_p13 = pnand %p1033_p1, %p1547_p9 }
 0x389   : > { %p1030_p2 = pneg %p1029_p13 }
 0x38b   : > { %s862_s5 = sand.u32 1, %s1885_s0  }
 0x38c   : > { %s863_s20 = scalar_lea.sflag [#allocation8], %s862_s5 }
 0x38d   : > { %1336 = dma.done.wait (%p1030_p2), %s863_s20, 256  }
 0x38e   : > { %1338 = vsyncadd (%p1030_p2), %s863_s20, 4294967040  ;;  %s29_s22 = sadd.s32 1, %s1389_s22   ;;  %s1888_s17 = sld [smem:[#allocation18_spill]] }
 0x38f   : > { %p1772_p10 = scmp.ge.s32.totalorder %s29_s22, 10   ;;  %s1889_s8 = sld [smem:[#allocation19_spill]] }
 0x390   : > { %s1890_s26 = sld [smem:[#allocation22_spill]]  ;;  %s1892_s28 = smov %s1912_s11 }
 0x391   : > { %s1891_s20 = sld [smem:[#allocation23_spill]]  ;;  %s1894_s11 = smov %s1345_s12 }
 0x392   : > { %s1895_s12 = smov %s1349_s13  ;;  %s1896_s13 = smov %s1625_s6 }
 0x393   : > { %s1897_s14 = smov %s1357_s15  ;;  %s1898_s15 = smov %s1361_s16 }
 0x394   : > { %s1899_s16 = smov %s1620_s3  ;;  %s1900_s18 = smov %s1385_s21 }
 0x395   : > { %s1902_s21 = smov %s1892_s28  ;;  %28 = sbr.rel (!%p1772_p10) target bundleno = 22 (0x16), region = 122 }
 0x396   : > { %s1901_s19 = smov %s1890_s26 }
 0x39a   :  { %869 = vsyncpa [#allocation7], 1 }
 0x39b   :  { %871 = vsyncpa [#allocation7 + $0x1], 1 }
 0x39c   :  { %872 = vsyncpa [#allocation10], 1 }
 0x39d   :  { %874 = vsyncpa [#allocation10 + $0x1], 1 }
 0x39e   :  { %875 = vsyncpa [#allocation8], 1 }
 0x39f   :  { %877 = vsyncpa [#allocation8 + $0x1], 1 }

</bundles_post_ra>
